<compile_context>
chip_gen: v5e
topology: v5e:2x2
jax: 0.10.0
libtpu: 0.0.40
codegen_flags: <defaults>
</compile_context>

<pallas_src>
import jax
import jax.numpy as jnp
from jax.experimental import pallas as pl
from jax.experimental.pallas import tpu as pltpu

SEQ = 196
FEAT = 263

# DMA chunking for the materialize path: at most 4 chunks, and never bother
# splitting below ~4096 rows (~4.3 MiB f32) per chunk — below that the
# descriptor overhead outweighs any engine-level overlap.
_MAX_DMA_CHUNKS = 4
_MIN_ROWS_PER_CHUNK = 4096


def _dma_copy_kernel(x_hbm, o_hbm, sems):
    """Direct HBM→HBM copy of a contiguous (rows, FEAT) slab.

    Chunk boundaries are static Python ints (derived from the static ref
    shape), so each chunk lowers to one plain DMA descriptor.  All chunks are
    started before any wait so independent DMA engines can overlap.
    """
    rows = x_hbm.shape[0]
    n = sems.shape[0]
    copies = []
    start = 0
    for c in range(n):
        stop = (rows * (c + 1)) // n
        size = stop - start
        if size <= 0:
            continue
        cp = pltpu.make_async_copy(
            x_hbm.at[pl.ds(start, size), :],
            o_hbm.at[pl.ds(start, size), :],
            sems.at[c],
        )
        cp.start()
        copies.append(cp)
        start = stop
    for cp in copies:
        cp.wait()


def _materialize_copy(x2d: jax.Array) -> jax.Array:
    """Physical copy of a (rows, FEAT) slab via direct HBM→HBM DMA."""
    rows, feat = x2d.shape
    n_chunks = max(1, min(_MAX_DMA_CHUNKS, rows // _MIN_ROWS_PER_CHUNK))
    bytes_accessed = 2 * rows * feat * jnp.dtype(x2d.dtype).itemsize
    return pl.pallas_call(
        _dma_copy_kernel,
        out_shape=jax.ShapeDtypeStruct((rows, feat), x2d.dtype),
        in_specs=[pl.BlockSpec(memory_space=pl.ANY)],
        out_specs=pl.BlockSpec(memory_space=pl.ANY),
        scratch_shapes=[pltpu.SemaphoreType.DMA((n_chunks,))],
        cost_estimate=pl.CostEstimate(
            flops=0, transcendentals=0, bytes_accessed=bytes_accessed
        ),
    )(x2d)


def continuous_rot_repr_decoder(
    module_input: jax.Array, *, materialize: bool = False
) -> jax.Array:
    """Pallas/JAX equivalent of ContinousRotReprDecoder.forward.

    materialize=False (default, production path): pure metadata reshape —
        zero data movement, exactly matching torch's .view(-1, 196, 263).
    materialize=True: additionally force a physically fresh buffer via a
        direct HBM→HBM DMA copy (only useful if a new buffer is required).
    """
    total = module_input.size
    assert total % (SEQ * FEAT) == 0, "input size must be divisible by 196*263"
    b = total // (SEQ * FEAT)

    if not materialize:
        # Preferred path: .view() is metadata-only, so is jnp.reshape.
        return module_input.reshape(b, SEQ, FEAT)

    # Row-major, bitcast-free 2-D surface (B*196, 263) — no transposes here.
    x2d = module_input.reshape(b * SEQ, FEAT)
    out2d = _materialize_copy(x2d)
    return out2d.reshape(b, SEQ, FEAT)


if __name__ == "__main__":
    key = jax.random.PRNGKey(0)
    batch = 2
    # Flat input, as typically fed to this decoder: (B, 196*263)
    x = jax.random.normal(key, (batch, SEQ * FEAT), dtype=jnp.float32)

    # Reference: plain reshape semantics (PyTorch .view(-1, 196, 263)).
    y_ref = x.reshape(-1, SEQ, FEAT)

    # Default (zero-copy) production path.
    y_fast = continuous_rot_repr_decoder(x)
    y_fast = jax.block_until_ready(y_fast)
    assert y_fast.shape == (batch, SEQ, FEAT), y_fast.shape
    assert y_fast.dtype == x.dtype
    assert bool(jnp.array_equal(y_fast, y_ref))

    # Pallas HBM→HBM DMA materializing path (exercises the kernel once).
    y_kernel = continuous_rot_repr_decoder(x, materialize=True)
    y_kernel = jax.block_until_ready(y_kernel)
    assert y_kernel.shape == (batch, SEQ, FEAT), y_kernel.shape
    assert y_kernel.dtype == x.dtype
    assert bool(jnp.array_equal(y_kernel, y_ref))

    # A second batch size to check the wrapper's -1 inference.
    x3 = jax.random.normal(jax.random.PRNGKey(1), (3 * SEQ * FEAT,), jnp.float32)
    y3 = jax.block_until_ready(continuous_rot_repr_decoder(x3, materialize=True))
    assert y3.shape == (3, SEQ, FEAT), y3.shape
    assert bool(jnp.array_equal(y3, x3.reshape(3, SEQ, FEAT)))

    print("KERNEL_OK")
</pallas_src>

<mosaic_0001>
module attributes {stable_mosaic.version = 11 : i64} {
  func.func @_dma_copy_kernel(%arg0: memref<392x263xf32, #tpu.memory_space<any>>, %arg1: memref<392x263xf32, #tpu.memory_space<any>>, %arg2: memref<1x!tpu.dma_semaphore, #tpu.memory_space<semaphore_mem>>) attributes {dimension_semantics = [], scalar_prefetch = 0 : i64, scratch_operands = 1 : i64, tpu.core_type = #tpu.core_type<tc>} {
    %c0_i32 = arith.constant 0 : i32
    %c0_i32_0 = arith.constant 0 : i32
    %c0_i32_1 = arith.constant 0 : i32
    %0 = tpu.memref_slice %arg0[%c0_i32_0, %c0_i32_1] : memref<392x263xf32, #tpu.memory_space<any>> -> memref<392x263xf32, #tpu.memory_space<any>>
    %c0_i32_2 = arith.constant 0 : i32
    %c0_i32_3 = arith.constant 0 : i32
    %1 = tpu.memref_slice %arg1[%c0_i32_2, %c0_i32_3] : memref<392x263xf32, #tpu.memory_space<any>> -> memref<392x263xf32, #tpu.memory_space<any>>
    %2 = tpu.memref_slice %arg2[%c0_i32] : memref<1x!tpu.dma_semaphore, #tpu.memory_space<semaphore_mem>> -> memref<1x!tpu.dma_semaphore, #tpu.memory_space<semaphore_mem>>
    %3 = tpu.memref_squeeze %2 : memref<1x!tpu.dma_semaphore, #tpu.memory_space<semaphore_mem>> -> memref<!tpu.dma_semaphore, #tpu.memory_space<semaphore_mem>>
    tpu.enqueue_dma source(%0 : memref<392x263xf32, #tpu.memory_space<any>>) target(%1 : memref<392x263xf32, #tpu.memory_space<any>>) target_semaphore(%3 : memref<!tpu.dma_semaphore, #tpu.memory_space<semaphore_mem>>)
    %c0_i32_4 = arith.constant 0 : i32
    %c0_i32_5 = arith.constant 0 : i32
    %c0_i32_6 = arith.constant 0 : i32
    %4 = tpu.memref_slice %arg0[%c0_i32_5, %c0_i32_6] : memref<392x263xf32, #tpu.memory_space<any>> -> memref<392x263xf32, #tpu.memory_space<any>>
    %c0_i32_7 = arith.constant 0 : i32
    %c0_i32_8 = arith.constant 0 : i32
    %5 = tpu.memref_slice %arg1[%c0_i32_7, %c0_i32_8] : memref<392x263xf32, #tpu.memory_space<any>> -> memref<392x263xf32, #tpu.memory_space<any>>
    %6 = tpu.memref_slice %arg2[%c0_i32_4] : memref<1x!tpu.dma_semaphore, #tpu.memory_space<semaphore_mem>> -> memref<1x!tpu.dma_semaphore, #tpu.memory_space<semaphore_mem>>
    %7 = tpu.memref_squeeze %6 : memref<1x!tpu.dma_semaphore, #tpu.memory_space<semaphore_mem>> -> memref<!tpu.dma_semaphore, #tpu.memory_space<semaphore_mem>>
    tpu.wait_dma2 semaphore(%7 : memref<!tpu.dma_semaphore, #tpu.memory_space<semaphore_mem>>) src(%4 : memref<392x263xf32, #tpu.memory_space<any>>) dst(%5 : memref<392x263xf32, #tpu.memory_space<any>>)
    return
  }
}

</mosaic_0001>

<bundles_post_ra>
// kernel: tpu_custom_call.1
= control target key start
LH: loop header
LB: loop body
LE: loop exit
PB: predicated region body
PF: predicated region fallthrough
CT: control target
= control target key end

     0   :  { %s1225_s0 = inlined_call_operand.vmem [shape: f32[392,263], index: 0, kind: input, shape index: {}]   ;;  %s1226_s1 = inlined_call_operand.vmem [shape: f32[392,263], index: 1, kind: output, shape index: {}]  }
   0x1   :  { %v16_v0 = vld [vmem:[%s1225_s0] sm:$0xff]  ;;  %v18_v1 = vld [vmem:[%s1225_s0 + $0x8] sm:$0xff]  ;;  %v20_v2 = vld [vmem:[%s1225_s0 + $0x10] sm:$0xff] }
   0x2   :  { %17 = vst [vmem:[%s1226_s1] sm:$0xff] %v16_v0  ;;  %v22_v3 = vld [vmem:[%s1225_s0 + $0x18] sm:$0xff]  ;;  %v24_v4 = vld [vmem:[%s1225_s0 + $0x20] sm:$0xff]  ;;  %v26_v5 = vld [vmem:[%s1225_s0 + $0x28] sm:$0xff] }
   0x3   :  { %19 = vst [vmem:[%s1226_s1 + $0x8] sm:$0xff] %v18_v1  ;;  %v28_v6 = vld [vmem:[%s1225_s0 + $0x30] sm:$0xff]  ;;  %v30_v7 = vld [vmem:[%s1225_s0 + $0x38] sm:$0xff]  ;;  %v32_v8 = vld [vmem:[%s1225_s0 + $0x40] sm:$0xff] }
   0x4   :  { %21 = vst [vmem:[%s1226_s1 + $0x10] sm:$0xff] %v20_v2  ;;  %v34_v9 = vld [vmem:[%s1225_s0 + $0x48] sm:$0xff]  ;;  %v36_v10 = vld [vmem:[%s1225_s0 + $0x50] sm:$0xff]  ;;  %v38_v11 = vld [vmem:[%s1225_s0 + $0x58] sm:$0xff] }
   0x5   :  { %23 = vst [vmem:[%s1226_s1 + $0x18] sm:$0xff] %v22_v3  ;;  %v40_v12 = vld [vmem:[%s1225_s0 + $0x60] sm:$0xff]  ;;  %v42_v13 = vld [vmem:[%s1225_s0 + $0x68] sm:$0xff]  ;;  %v44_v14 = vld [vmem:[%s1225_s0 + $0x70] sm:$0xff] }
   0x6   :  { %25 = vst [vmem:[%s1226_s1 + $0x20] sm:$0xff] %v24_v4  ;;  %v46_v15 = vld [vmem:[%s1225_s0 + $0x78] sm:$0xff]  ;;  %v48_v16 = vld [vmem:[%s1225_s0 + $0x80] sm:$0xff]  ;;  %v50_v17 = vld [vmem:[%s1225_s0 + $0x88] sm:$0xff] }
   0x7   :  { %27 = vst [vmem:[%s1226_s1 + $0x28] sm:$0xff] %v26_v5  ;;  %v52_v18 = vld [vmem:[%s1225_s0 + $0x90] sm:$0xff]  ;;  %v54_v19 = vld [vmem:[%s1225_s0 + $0x98] sm:$0xff]  ;;  %v56_v20 = vld [vmem:[%s1225_s0 + $0xa0] sm:$0xff] }
   0x8   :  { %29 = vst [vmem:[%s1226_s1 + $0x30] sm:$0xff] %v28_v6  ;;  %v58_v21 = vld [vmem:[%s1225_s0 + $0xa8] sm:$0xff]  ;;  %v60_v22 = vld [vmem:[%s1225_s0 + $0xb0] sm:$0xff]  ;;  %v62_v23 = vld [vmem:[%s1225_s0 + $0xb8] sm:$0xff] }
   0x9   :  { %31 = vst [vmem:[%s1226_s1 + $0x38] sm:$0xff] %v30_v7  ;;  %v64_v24 = vld [vmem:[%s1225_s0 + $0xc0] sm:$0xff]  ;;  %v66_v25 = vld [vmem:[%s1225_s0 + $0xc8] sm:$0xff]  ;;  %v68_v26 = vld [vmem:[%s1225_s0 + $0xd0] sm:$0xff] }
   0xa   :  { %33 = vst [vmem:[%s1226_s1 + $0x40] sm:$0xff] %v32_v8  ;;  %v70_v27 = vld [vmem:[%s1225_s0 + $0xd8] sm:$0xff]  ;;  %v72_v28 = vld [vmem:[%s1225_s0 + $0xe0] sm:$0xff]  ;;  %v74_v29 = vld [vmem:[%s1225_s0 + $0xe8] sm:$0xff] }
   0xb   :  { %35 = vst [vmem:[%s1226_s1 + $0x48] sm:$0xff] %v34_v9  ;;  %v76_v30 = vld [vmem:[%s1225_s0 + $0xf0] sm:$0xff]  ;;  %v78_v31 = vld [vmem:[%s1225_s0 + $0xf8] sm:$0xff]  ;;  %v80_v32 = vld [vmem:[%s1225_s0 + $0x100] sm:$0xff] }
   0xc   :  { %37 = vst [vmem:[%s1226_s1 + $0x50] sm:$0xff] %v36_v10  ;;  %v82_v33 = vld [vmem:[%s1225_s0 + $0x108] sm:$0xff]  ;;  %v84_v34 = vld [vmem:[%s1225_s0 + $0x110] sm:$0xff]  ;;  %v86_v35 = vld [vmem:[%s1225_s0 + $0x118] sm:$0xff] }
   0xd   :  { %39 = vst [vmem:[%s1226_s1 + $0x58] sm:$0xff] %v38_v11  ;;  %v88_v36 = vld [vmem:[%s1225_s0 + $0x120] sm:$0xff]  ;;  %v90_v37 = vld [vmem:[%s1225_s0 + $0x128] sm:$0xff]  ;;  %v92_v38 = vld [vmem:[%s1225_s0 + $0x130] sm:$0xff] }
   0xe   :  { %41 = vst [vmem:[%s1226_s1 + $0x60] sm:$0xff] %v40_v12  ;;  %v94_v39 = vld [vmem:[%s1225_s0 + $0x138] sm:$0xff]  ;;  %v96_v40 = vld [vmem:[%s1225_s0 + $0x140] sm:$0xff]  ;;  %v98_v41 = vld [vmem:[%s1225_s0 + $0x148] sm:$0xff] }
   0xf   :  { %43 = vst [vmem:[%s1226_s1 + $0x68] sm:$0xff] %v42_v13  ;;  %v100_v42 = vld [vmem:[%s1225_s0 + $0x150] sm:$0xff]  ;;  %v102_v43 = vld [vmem:[%s1225_s0 + $0x158] sm:$0xff]  ;;  %v104_v44 = vld [vmem:[%s1225_s0 + $0x160] sm:$0xff] }
  0x10   :  { %45 = vst [vmem:[%s1226_s1 + $0x70] sm:$0xff] %v44_v14  ;;  %v106_v45 = vld [vmem:[%s1225_s0 + $0x168] sm:$0xff]  ;;  %v108_v46 = vld [vmem:[%s1225_s0 + $0x170] sm:$0xff]  ;;  %v110_v47 = vld [vmem:[%s1225_s0 + $0x178] sm:$0xff] }
  0x11   :  { %47 = vst [vmem:[%s1226_s1 + $0x78] sm:$0xff] %v46_v15  ;;  %v112_v48 = vld [vmem:[%s1225_s0 + $0x180] sm:$0xff]  ;;  %v114_v49 = vld [vmem:[%s1225_s0 + $0x188] sm:$0xff]  ;;  %v116_v50 = vld [vmem:[%s1225_s0 + $0x190] sm:$0xff] }
  0x12   :  { %49 = vst [vmem:[%s1226_s1 + $0x80] sm:$0xff] %v48_v16  ;;  %v118_v51 = vld [vmem:[%s1225_s0 + $0x198] sm:$0xff]  ;;  %v120_v52 = vld [vmem:[%s1225_s0 + $0x1a0] sm:$0xff]  ;;  %v122_v53 = vld [vmem:[%s1225_s0 + $0x1a8] sm:$0xff] }
  0x13   :  { %51 = vst [vmem:[%s1226_s1 + $0x88] sm:$0xff] %v50_v17  ;;  %v124_v54 = vld [vmem:[%s1225_s0 + $0x1b0] sm:$0xff]  ;;  %v126_v55 = vld [vmem:[%s1225_s0 + $0x1b8] sm:$0xff]  ;;  %v128_v56 = vld [vmem:[%s1225_s0 + $0x1c0] sm:$0xff] }
  0x14   :  { %53 = vst [vmem:[%s1226_s1 + $0x90] sm:$0xff] %v52_v18  ;;  %v130_v57 = vld [vmem:[%s1225_s0 + $0x1c8] sm:$0xff]  ;;  %v132_v58 = vld [vmem:[%s1225_s0 + $0x1d0] sm:$0xff]  ;;  %v134_v59 = vld [vmem:[%s1225_s0 + $0x1d8] sm:$0xff] }
  0x15   :  { %55 = vst [vmem:[%s1226_s1 + $0x98] sm:$0xff] %v54_v19  ;;  %v136_v60 = vld [vmem:[%s1225_s0 + $0x1e0] sm:$0xff]  ;;  %v138_v61 = vld [vmem:[%s1225_s0 + $0x1e8] sm:$0xff]  ;;  %v140_v62 = vld [vmem:[%s1225_s0 + $0x1f0] sm:$0xff] }
  0x16   :  { %57 = vst [vmem:[%s1226_s1 + $0xa0] sm:$0xff] %v56_v20  ;;  %v142_v63 = vld [vmem:[%s1225_s0 + $0x1f8] sm:$0xff]  ;;  %v144_v0 = vld [vmem:[%s1225_s0 + $0x200] sm:$0xff]  ;;  %v146_v1 = vld [vmem:[%s1225_s0 + $0x208] sm:$0xff] }
  0x17   :  { %59 = vst [vmem:[%s1226_s1 + $0xa8] sm:$0xff] %v58_v21  ;;  %v148_v2 = vld [vmem:[%s1225_s0 + $0x210] sm:$0xff]  ;;  %v150_v3 = vld [vmem:[%s1225_s0 + $0x218] sm:$0xff]  ;;  %v152_v4 = vld [vmem:[%s1225_s0 + $0x220] sm:$0xff] }
  0x18   :  { %61 = vst [vmem:[%s1226_s1 + $0xb0] sm:$0xff] %v60_v22  ;;  %v154_v5 = vld [vmem:[%s1225_s0 + $0x228] sm:$0xff]  ;;  %v156_v6 = vld [vmem:[%s1225_s0 + $0x230] sm:$0xff]  ;;  %v158_v7 = vld [vmem:[%s1225_s0 + $0x238] sm:$0xff] }
  0x19   :  { %63 = vst [vmem:[%s1226_s1 + $0xb8] sm:$0xff] %v62_v23  ;;  %v160_v8 = vld [vmem:[%s1225_s0 + $0x240] sm:$0xff]  ;;  %v162_v9 = vld [vmem:[%s1225_s0 + $0x248] sm:$0xff]  ;;  %v164_v10 = vld [vmem:[%s1225_s0 + $0x250] sm:$0xff] }
  0x1a   :  { %65 = vst [vmem:[%s1226_s1 + $0xc0] sm:$0xff] %v64_v24  ;;  %v166_v11 = vld [vmem:[%s1225_s0 + $0x258] sm:$0xff]  ;;  %v168_v12 = vld [vmem:[%s1225_s0 + $0x260] sm:$0xff]  ;;  %v170_v13 = vld [vmem:[%s1225_s0 + $0x268] sm:$0xff] }
  0x1b   :  { %67 = vst [vmem:[%s1226_s1 + $0xc8] sm:$0xff] %v66_v25  ;;  %v172_v14 = vld [vmem:[%s1225_s0 + $0x270] sm:$0xff]  ;;  %v174_v15 = vld [vmem:[%s1225_s0 + $0x278] sm:$0xff]  ;;  %v176_v16 = vld [vmem:[%s1225_s0 + $0x280] sm:$0xff] }
  0x1c   :  { %69 = vst [vmem:[%s1226_s1 + $0xd0] sm:$0xff] %v68_v26  ;;  %v178_v17 = vld [vmem:[%s1225_s0 + $0x288] sm:$0xff]  ;;  %v180_v18 = vld [vmem:[%s1225_s0 + $0x290] sm:$0xff]  ;;  %v182_v19 = vld [vmem:[%s1225_s0 + $0x298] sm:$0xff] }
  0x1d   :  { %71 = vst [vmem:[%s1226_s1 + $0xd8] sm:$0xff] %v70_v27  ;;  %v184_v20 = vld [vmem:[%s1225_s0 + $0x2a0] sm:$0xff]  ;;  %v186_v21 = vld [vmem:[%s1225_s0 + $0x2a8] sm:$0xff]  ;;  %v188_v22 = vld [vmem:[%s1225_s0 + $0x2b0] sm:$0xff] }
  0x1e   :  { %73 = vst [vmem:[%s1226_s1 + $0xe0] sm:$0xff] %v72_v28  ;;  %v190_v23 = vld [vmem:[%s1225_s0 + $0x2b8] sm:$0xff]  ;;  %v192_v24 = vld [vmem:[%s1225_s0 + $0x2c0] sm:$0xff]  ;;  %v194_v25 = vld [vmem:[%s1225_s0 + $0x2c8] sm:$0xff] }
  0x1f   :  { %75 = vst [vmem:[%s1226_s1 + $0xe8] sm:$0xff] %v74_v29  ;;  %v196_v26 = vld [vmem:[%s1225_s0 + $0x2d0] sm:$0xff]  ;;  %v198_v27 = vld [vmem:[%s1225_s0 + $0x2d8] sm:$0xff]  ;;  %v200_v28 = vld [vmem:[%s1225_s0 + $0x2e0] sm:$0xff] }
  0x20   :  { %77 = vst [vmem:[%s1226_s1 + $0xf0] sm:$0xff] %v76_v30  ;;  %v202_v29 = vld [vmem:[%s1225_s0 + $0x2e8] sm:$0xff]  ;;  %v204_v30 = vld [vmem:[%s1225_s0 + $0x2f0] sm:$0xff] }
  0x21   :  { %79 = vst [vmem:[%s1226_s1 + $0xf8] sm:$0xff] %v78_v31  ;;  %v206_v31 = vld [vmem:[%s1225_s0 + $0x2f8] sm:$0xff] }
  0x22   :  { %81 = vst [vmem:[%s1226_s1 + $0x100] sm:$0xff] %v80_v32  ;;  %v208_v32 = vld [vmem:[%s1225_s0 + $0x300] sm:$0xff] }
  0x23   :  { %83 = vst [vmem:[%s1226_s1 + $0x108] sm:$0xff] %v82_v33  ;;  %v210_v33 = vld [vmem:[%s1225_s0 + $0x308] sm:$0xff] }
  0x24   :  { %85 = vst [vmem:[%s1226_s1 + $0x110] sm:$0xff] %v84_v34  ;;  %v212_v34 = vld [vmem:[%s1225_s0 + $0x310] sm:$0xff] }
  0x25   :  { %87 = vst [vmem:[%s1226_s1 + $0x118] sm:$0xff] %v86_v35  ;;  %v214_v35 = vld [vmem:[%s1225_s0 + $0x318] sm:$0xff] }
  0x26   :  { %89 = vst [vmem:[%s1226_s1 + $0x120] sm:$0xff] %v88_v36  ;;  %v216_v36 = vld [vmem:[%s1225_s0 + $0x320] sm:$0xff] }
  0x27   :  { %91 = vst [vmem:[%s1226_s1 + $0x128] sm:$0xff] %v90_v37  ;;  %v218_v37 = vld [vmem:[%s1225_s0 + $0x328] sm:$0xff] }
  0x28   :  { %93 = vst [vmem:[%s1226_s1 + $0x130] sm:$0xff] %v92_v38  ;;  %v220_v38 = vld [vmem:[%s1225_s0 + $0x330] sm:$0xff] }
  0x29   :  { %95 = vst [vmem:[%s1226_s1 + $0x138] sm:$0xff] %v94_v39  ;;  %v222_v39 = vld [vmem:[%s1225_s0 + $0x338] sm:$0xff] }
  0x2a   :  { %97 = vst [vmem:[%s1226_s1 + $0x140] sm:$0xff] %v96_v40  ;;  %v224_v40 = vld [vmem:[%s1225_s0 + $0x340] sm:$0xff] }
  0x2b   :  { %99 = vst [vmem:[%s1226_s1 + $0x148] sm:$0xff] %v98_v41  ;;  %v226_v41 = vld [vmem:[%s1225_s0 + $0x348] sm:$0xff] }
  0x2c   :  { %101 = vst [vmem:[%s1226_s1 + $0x150] sm:$0xff] %v100_v42  ;;  %v228_v42 = vld [vmem:[%s1225_s0 + $0x350] sm:$0xff] }
  0x2d   :  { %103 = vst [vmem:[%s1226_s1 + $0x158] sm:$0xff] %v102_v43  ;;  %v230_v43 = vld [vmem:[%s1225_s0 + $0x358] sm:$0xff] }
  0x2e   :  { %105 = vst [vmem:[%s1226_s1 + $0x160] sm:$0xff] %v104_v44  ;;  %v232_v44 = vld [vmem:[%s1225_s0 + $0x360] sm:$0xff] }
  0x2f   :  { %107 = vst [vmem:[%s1226_s1 + $0x168] sm:$0xff] %v106_v45  ;;  %v234_v45 = vld [vmem:[%s1225_s0 + $0x368] sm:$0xff] }
  0x30   :  { %109 = vst [vmem:[%s1226_s1 + $0x170] sm:$0xff] %v108_v46  ;;  %v236_v46 = vld [vmem:[%s1225_s0 + $0x370] sm:$0xff] }
  0x31   :  { %111 = vst [vmem:[%s1226_s1 + $0x178] sm:$0xff] %v110_v47  ;;  %v238_v47 = vld [vmem:[%s1225_s0 + $0x378] sm:$0xff] }
  0x32   :  { %113 = vst [vmem:[%s1226_s1 + $0x180] sm:$0xff] %v112_v48  ;;  %v240_v48 = vld [vmem:[%s1225_s0 + $0x380] sm:$0xff] }
  0x33   :  { %115 = vst [vmem:[%s1226_s1 + $0x188] sm:$0xff] %v114_v49  ;;  %v242_v49 = vld [vmem:[%s1225_s0 + $0x388] sm:$0xff] }
  0x34   :  { %117 = vst [vmem:[%s1226_s1 + $0x190] sm:$0xff] %v116_v50  ;;  %v244_v50 = vld [vmem:[%s1225_s0 + $0x390] sm:$0xff] }
  0x35   :  { %119 = vst [vmem:[%s1226_s1 + $0x198] sm:$0xff] %v118_v51  ;;  %v246_v51 = vld [vmem:[%s1225_s0 + $0x398] sm:$0xff] }
  0x36   :  { %121 = vst [vmem:[%s1226_s1 + $0x1a0] sm:$0xff] %v120_v52  ;;  %v248_v52 = vld [vmem:[%s1225_s0 + $0x3a0] sm:$0xff] }
  0x37   :  { %123 = vst [vmem:[%s1226_s1 + $0x1a8] sm:$0xff] %v122_v53  ;;  %v250_v53 = vld [vmem:[%s1225_s0 + $0x3a8] sm:$0xff] }
  0x38   :  { %125 = vst [vmem:[%s1226_s1 + $0x1b0] sm:$0xff] %v124_v54  ;;  %v252_v54 = vld [vmem:[%s1225_s0 + $0x3b0] sm:$0xff] }
  0x39   :  { %127 = vst [vmem:[%s1226_s1 + $0x1b8] sm:$0xff] %v126_v55  ;;  %v254_v55 = vld [vmem:[%s1225_s0 + $0x3b8] sm:$0xff] }
  0x3a   :  { %129 = vst [vmem:[%s1226_s1 + $0x1c0] sm:$0xff] %v128_v56  ;;  %v256_v56 = vld [vmem:[%s1225_s0 + $0x3c0] sm:$0xff] }
  0x3b   :  { %131 = vst [vmem:[%s1226_s1 + $0x1c8] sm:$0xff] %v130_v57  ;;  %v258_v57 = vld [vmem:[%s1225_s0 + $0x3c8] sm:$0xff] }
  0x3c   :  { %133 = vst [vmem:[%s1226_s1 + $0x1d0] sm:$0xff] %v132_v58  ;;  %v260_v58 = vld [vmem:[%s1225_s0 + $0x3d0] sm:$0xff] }
  0x3d   :  { %135 = vst [vmem:[%s1226_s1 + $0x1d8] sm:$0xff] %v134_v59  ;;  %v262_v59 = vld [vmem:[%s1225_s0 + $0x3d8] sm:$0xff] }
  0x3e   :  { %137 = vst [vmem:[%s1226_s1 + $0x1e0] sm:$0xff] %v136_v60  ;;  %v264_v60 = vld [vmem:[%s1225_s0 + $0x3e0] sm:$0xff] }
  0x3f   :  { %139 = vst [vmem:[%s1226_s1 + $0x1e8] sm:$0xff] %v138_v61  ;;  %v266_v61 = vld [vmem:[%s1225_s0 + $0x3e8] sm:$0xff] }
  0x40   :  { %141 = vst [vmem:[%s1226_s1 + $0x1f0] sm:$0xff] %v140_v62  ;;  %v268_v62 = vld [vmem:[%s1225_s0 + $0x3f0] sm:$0xff] }
  0x41   :  { %143 = vst [vmem:[%s1226_s1 + $0x1f8] sm:$0xff] %v142_v63  ;;  %v270_v63 = vld [vmem:[%s1225_s0 + $0x3f8] sm:$0xff] }
  0x42   :  { %145 = vst [vmem:[%s1226_s1 + $0x200] sm:$0xff] %v144_v0  ;;  %v272_v0 = vld [vmem:[%s1225_s0 + $0x400] sm:$0xff] }
  0x43   :  { %147 = vst [vmem:[%s1226_s1 + $0x208] sm:$0xff] %v146_v1  ;;  %v274_v1 = vld [vmem:[%s1225_s0 + $0x408] sm:$0xff] }
  0x44   :  { %149 = vst [vmem:[%s1226_s1 + $0x210] sm:$0xff] %v148_v2  ;;  %v276_v2 = vld [vmem:[%s1225_s0 + $0x410] sm:$0xff] }
  0x45   :  { %151 = vst [vmem:[%s1226_s1 + $0x218] sm:$0xff] %v150_v3  ;;  %v278_v3 = vld [vmem:[%s1225_s0 + $0x418] sm:$0xff] }
  0x46   :  { %153 = vst [vmem:[%s1226_s1 + $0x220] sm:$0xff] %v152_v4  ;;  %v280_v4 = vld [vmem:[%s1225_s0 + $0x420] sm:$0xff] }
  0x47   :  { %155 = vst [vmem:[%s1226_s1 + $0x228] sm:$0xff] %v154_v5  ;;  %v282_v5 = vld [vmem:[%s1225_s0 + $0x428] sm:$0xff] }
  0x48   :  { %157 = vst [vmem:[%s1226_s1 + $0x230] sm:$0xff] %v156_v6  ;;  %v284_v6 = vld [vmem:[%s1225_s0 + $0x430] sm:$0xff] }
  0x49   :  { %159 = vst [vmem:[%s1226_s1 + $0x238] sm:$0xff] %v158_v7  ;;  %v286_v7 = vld [vmem:[%s1225_s0 + $0x438] sm:$0xff] }
  0x4a   :  { %161 = vst [vmem:[%s1226_s1 + $0x240] sm:$0xff] %v160_v8  ;;  %v288_v8 = vld [vmem:[%s1225_s0 + $0x440] sm:$0xff] }
  0x4b   :  { %163 = vst [vmem:[%s1226_s1 + $0x248] sm:$0xff] %v162_v9  ;;  %v290_v9 = vld [vmem:[%s1225_s0 + $0x448] sm:$0xff] }
  0x4c   :  { %165 = vst [vmem:[%s1226_s1 + $0x250] sm:$0xff] %v164_v10  ;;  %v292_v10 = vld [vmem:[%s1225_s0 + $0x450] sm:$0xff] }
  0x4d   :  { %167 = vst [vmem:[%s1226_s1 + $0x258] sm:$0xff] %v166_v11  ;;  %v294_v11 = vld [vmem:[%s1225_s0 + $0x458] sm:$0xff] }
  0x4e   :  { %169 = vst [vmem:[%s1226_s1 + $0x260] sm:$0xff] %v168_v12  ;;  %v296_v12 = vld [vmem:[%s1225_s0 + $0x460] sm:$0xff] }
  0x4f   :  { %171 = vst [vmem:[%s1226_s1 + $0x268] sm:$0xff] %v170_v13  ;;  %v298_v13 = vld [vmem:[%s1225_s0 + $0x468] sm:$0xff] }
  0x50   :  { %173 = vst [vmem:[%s1226_s1 + $0x270] sm:$0xff] %v172_v14  ;;  %v300_v14 = vld [vmem:[%s1225_s0 + $0x470] sm:$0xff] }
  0x51   :  { %175 = vst [vmem:[%s1226_s1 + $0x278] sm:$0xff] %v174_v15  ;;  %v302_v15 = vld [vmem:[%s1225_s0 + $0x478] sm:$0xff] }
  0x52   :  { %177 = vst [vmem:[%s1226_s1 + $0x280] sm:$0xff] %v176_v16  ;;  %v304_v16 = vld [vmem:[%s1225_s0 + $0x480] sm:$0xff] }
  0x53   :  { %179 = vst [vmem:[%s1226_s1 + $0x288] sm:$0xff] %v178_v17  ;;  %v306_v17 = vld [vmem:[%s1225_s0 + $0x488] sm:$0xff] }
  0x54   :  { %181 = vst [vmem:[%s1226_s1 + $0x290] sm:$0xff] %v180_v18  ;;  %v308_v18 = vld [vmem:[%s1225_s0 + $0x490] sm:$0xff] }
  0x55   :  { %183 = vst [vmem:[%s1226_s1 + $0x298] sm:$0xff] %v182_v19 }
  0x56   :  { %185 = vst [vmem:[%s1226_s1 + $0x2a0] sm:$0xff] %v184_v20 }
  0x57   :  { %187 = vst [vmem:[%s1226_s1 + $0x2a8] sm:$0xff] %v186_v21 }
  0x58   :  { %189 = vst [vmem:[%s1226_s1 + $0x2b0] sm:$0xff] %v188_v22 }
  0x59   :  { %191 = vst [vmem:[%s1226_s1 + $0x2b8] sm:$0xff] %v190_v23 }
  0x5a   :  { %193 = vst [vmem:[%s1226_s1 + $0x2c0] sm:$0xff] %v192_v24 }
  0x5b   :  { %195 = vst [vmem:[%s1226_s1 + $0x2c8] sm:$0xff] %v194_v25 }
  0x5c   :  { %197 = vst [vmem:[%s1226_s1 + $0x2d0] sm:$0xff] %v196_v26 }
  0x5d   :  { %199 = vst [vmem:[%s1226_s1 + $0x2d8] sm:$0xff] %v198_v27 }
  0x5e   :  { %201 = vst [vmem:[%s1226_s1 + $0x2e0] sm:$0xff] %v200_v28 }
  0x5f   :  { %203 = vst [vmem:[%s1226_s1 + $0x2e8] sm:$0xff] %v202_v29 }
  0x60   :  { %205 = vst [vmem:[%s1226_s1 + $0x2f0] sm:$0xff] %v204_v30 }
  0x61   :  { %207 = vst [vmem:[%s1226_s1 + $0x2f8] sm:$0xff] %v206_v31 }
  0x62   :  { %209 = vst [vmem:[%s1226_s1 + $0x300] sm:$0xff] %v208_v32 }
  0x63   :  { %211 = vst [vmem:[%s1226_s1 + $0x308] sm:$0xff] %v210_v33 }
  0x64   :  { %213 = vst [vmem:[%s1226_s1 + $0x310] sm:$0xff] %v212_v34 }
  0x65   :  { %215 = vst [vmem:[%s1226_s1 + $0x318] sm:$0xff] %v214_v35 }
  0x66   :  { %217 = vst [vmem:[%s1226_s1 + $0x320] sm:$0xff] %v216_v36 }
  0x67   :  { %219 = vst [vmem:[%s1226_s1 + $0x328] sm:$0xff] %v218_v37 }
  0x68   :  { %221 = vst [vmem:[%s1226_s1 + $0x330] sm:$0xff] %v220_v38 }
  0x69   :  { %223 = vst [vmem:[%s1226_s1 + $0x338] sm:$0xff] %v222_v39 }
  0x6a   :  { %225 = vst [vmem:[%s1226_s1 + $0x340] sm:$0xff] %v224_v40 }
  0x6b   :  { %227 = vst [vmem:[%s1226_s1 + $0x348] sm:$0xff] %v226_v41 }
  0x6c   :  { %229 = vst [vmem:[%s1226_s1 + $0x350] sm:$0xff] %v228_v42 }
  0x6d   :  { %231 = vst [vmem:[%s1226_s1 + $0x358] sm:$0xff] %v230_v43 }
  0x6e   :  { %233 = vst [vmem:[%s1226_s1 + $0x360] sm:$0xff] %v232_v44 }
  0x6f   :  { %235 = vst [vmem:[%s1226_s1 + $0x368] sm:$0xff] %v234_v45 }
  0x70   :  { %237 = vst [vmem:[%s1226_s1 + $0x370] sm:$0xff] %v236_v46 }
  0x71   :  { %239 = vst [vmem:[%s1226_s1 + $0x378] sm:$0xff] %v238_v47 }
  0x72   :  { %241 = vst [vmem:[%s1226_s1 + $0x380] sm:$0xff] %v240_v48 }
  0x73   :  { %243 = vst [vmem:[%s1226_s1 + $0x388] sm:$0xff] %v242_v49 }
  0x74   :  { %245 = vst [vmem:[%s1226_s1 + $0x390] sm:$0xff] %v244_v50 }
  0x75   :  { %247 = vst [vmem:[%s1226_s1 + $0x398] sm:$0xff] %v246_v51 }
  0x76   :  { %249 = vst [vmem:[%s1226_s1 + $0x3a0] sm:$0xff] %v248_v52 }
  0x77   :  { %251 = vst [vmem:[%s1226_s1 + $0x3a8] sm:$0xff] %v250_v53 }
  0x78   :  { %253 = vst [vmem:[%s1226_s1 + $0x3b0] sm:$0xff] %v252_v54 }
  0x79   :  { %255 = vst [vmem:[%s1226_s1 + $0x3b8] sm:$0xff] %v254_v55 }
  0x7a   :  { %257 = vst [vmem:[%s1226_s1 + $0x3c0] sm:$0xff] %v256_v56 }
  0x7b   :  { %259 = vst [vmem:[%s1226_s1 + $0x3c8] sm:$0xff] %v258_v57 }
  0x7c   :  { %261 = vst [vmem:[%s1226_s1 + $0x3d0] sm:$0xff] %v260_v58 }
  0x7d   :  { %263 = vst [vmem:[%s1226_s1 + $0x3d8] sm:$0xff] %v262_v59 }
  0x7e   :  { %265 = vst [vmem:[%s1226_s1 + $0x3e0] sm:$0xff] %v264_v60 }
  0x7f   :  { %267 = vst [vmem:[%s1226_s1 + $0x3e8] sm:$0xff] %v266_v61 }
  0x80   :  { %269 = vst [vmem:[%s1226_s1 + $0x3f0] sm:$0xff] %v268_v62 }
  0x81   :  { %271 = vst [vmem:[%s1226_s1 + $0x3f8] sm:$0xff] %v270_v63 }
  0x82   :  { %273 = vst [vmem:[%s1226_s1 + $0x400] sm:$0xff] %v272_v0 }
  0x83   :  { %275 = vst [vmem:[%s1226_s1 + $0x408] sm:$0xff] %v274_v1 }
  0x84   :  { %277 = vst [vmem:[%s1226_s1 + $0x410] sm:$0xff] %v276_v2 }
  0x85   :  { %279 = vst [vmem:[%s1226_s1 + $0x418] sm:$0xff] %v278_v3 }
  0x86   :  { %281 = vst [vmem:[%s1226_s1 + $0x420] sm:$0xff] %v280_v4 }
  0x87   :  { %283 = vst [vmem:[%s1226_s1 + $0x428] sm:$0xff] %v282_v5 }
  0x88   :  { %285 = vst [vmem:[%s1226_s1 + $0x430] sm:$0xff] %v284_v6 }
  0x89   :  { %287 = vst [vmem:[%s1226_s1 + $0x438] sm:$0xff] %v286_v7 }
  0x8a   :  { %289 = vst [vmem:[%s1226_s1 + $0x440] sm:$0xff] %v288_v8 }
  0x8b   :  { %291 = vst [vmem:[%s1226_s1 + $0x448] sm:$0xff] %v290_v9 }
  0x8c   :  { %293 = vst [vmem:[%s1226_s1 + $0x450] sm:$0xff] %v292_v10 }
  0x8d   :  { %295 = vst [vmem:[%s1226_s1 + $0x458] sm:$0xff] %v294_v11 }
  0x8e   :  { %297 = vst [vmem:[%s1226_s1 + $0x460] sm:$0xff] %v296_v12 }
  0x8f   :  { %299 = vst [vmem:[%s1226_s1 + $0x468] sm:$0xff] %v298_v13 }
  0x90   :  { %301 = vst [vmem:[%s1226_s1 + $0x470] sm:$0xff] %v300_v14 }
  0x91   :  { %303 = vst [vmem:[%s1226_s1 + $0x478] sm:$0xff] %v302_v15 }
  0x92   :  { %305 = vst [vmem:[%s1226_s1 + $0x480] sm:$0xff] %v304_v16 }
  0x93   :  { %307 = vst [vmem:[%s1226_s1 + $0x488] sm:$0xff] %v306_v17 }
  0x94   :  { %309 = vst [vmem:[%s1226_s1 + $0x490] sm:$0xff] %v308_v18 }
  0x95   :  { %315 = vsyncadd [#allocation2], 18816 }
  0x96   :  { %331 = dma.done.wait [#allocation2], 18816 }
  0x97   :  { %332 = vsyncadd [#allocation2], 4294948480 }
  0x98   :  { %320 = vsyncmov [#allocation2] }
  0x9b   :  { %s321_s14 = vpop.sfrf %320 }
  0x9c   :  { %p330_p0 = scmp.ne.s32.totalorder %s321_s14, 0 }
  0x9e   :  { %325 = shalt.err (%p330_p0)  }

</bundles_post_ra>
